<compile_context>
chip_gen: v7x
topology: tpu7x:2x2x1
jax: 0.10.0
libtpu: 0.0.40
codegen_flags: <defaults>
</compile_context>

<pallas_src>
import jax
import jax.numpy as jnp
from jax.experimental import pallas as pl
from jax.experimental.pallas import tpu as pltpu


def _prenorm_kernel(x_ref, shift_ref, scale_ref, o_ref):
    # x_ref:     (tile_rows, width)
    # shift_ref: (1, width)   broadcast over rows, resident across grid steps
    # scale_ref: (1, width)   broadcast over rows, resident across grid steps
    o_ref[...] = (x_ref[...] + shift_ref[...]) * scale_ref[...]


def _sublane_multiple(dtype) -> int:
    # f32 -> 8, bf16/f16 -> 16, int8/fp8 -> 32 (sublane packing).
    itemsize = jnp.dtype(dtype).itemsize
    return max(8, 32 // max(itemsize, 1))


def prenorm_forward(x, shift, scale, *, tile_rows=None,
                    target_block_bytes=2 * 1024 * 1024):
    """Apply PreNormLayer forward: (x + shift) * scale over the last dim.

    x:      (..., n_units)
    shift:  (n_units,)
    scale:  (n_units,)
    """
    n_units = x.shape[-1]
    assert shift.shape == (n_units,) and scale.shape == (n_units,)

    orig_shape = x.shape
    out_dtype = x.dtype

    x2 = x.reshape(-1, n_units)
    rows = x2.shape[0]

    shift2 = shift.reshape(1, n_units).astype(out_dtype)
    scale2 = scale.reshape(1, n_units).astype(out_dtype)

    # ---- lane-dense folding for narrow feature dims -------------------------
    # Fold G consecutive rows into the lane axis so the last dim is a multiple
    # of 128 (full-width unmasked stores). Pure layout plumbing: row-major
    # reshape + tiled shift/scale reproduce exactly the same math.
    width = n_units
    rows_eff = rows
    if n_units < 128 and 128 % n_units == 0:
        g = 128 // n_units
        if rows % g == 0 and rows >= g:
            rows_eff = rows // g
            width = n_units * g
            x2 = x2.reshape(rows_eff, width)
            shift2 = jnp.tile(shift2, (1, g))
            scale2 = jnp.tile(scale2, (1, g))

    # ---- tile-size selection -------------------------------------------------
    sub = _sublane_multiple(out_dtype)
    bytes_per_row = width * jnp.dtype(out_dtype).itemsize
    if tile_rows is None:
        # ~target_block_bytes per block, rounded to the sublane packing.
        tile_rows = max(sub, target_block_bytes // max(bytes_per_row, 1))
        tile_rows = max(sub, (tile_rows // sub) * sub)
        tile_rows = min(tile_rows, 4096)
    if tile_rows >= rows_eff:
        # Single block covering the whole array (full-dim block is always legal).
        tile_rows = rows_eff
    else:
        tile_rows = max(sub, (tile_rows // sub) * sub)

    grid = (pl.cdiv(rows_eff, tile_rows),)  # ragged last block handled by Pallas

    out = pl.pallas_call(
        _prenorm_kernel,
        out_shape=jax.ShapeDtypeStruct((rows_eff, width), out_dtype),
        grid_spec=pltpu.PrefetchScalarGridSpec(
            num_scalar_prefetch=0,
            grid=grid,
            in_specs=[
                pl.BlockSpec((tile_rows, width), lambda i: (i, 0)),
                pl.BlockSpec((1, width), lambda i: (0, 0)),
                pl.BlockSpec((1, width), lambda i: (0, 0)),
            ],
            out_specs=pl.BlockSpec((tile_rows, width), lambda i: (i, 0)),
        ),
        compiler_params=pltpu.CompilerParams(
            dimension_semantics=("parallel",),
        ),
    )(x2, shift2, scale2)

    return out.reshape(orig_shape)


if __name__ == "__main__":
    key = jax.random.PRNGKey(0)
    k_x, k_shift, k_scale, k_x2 = jax.random.split(key, 4)

    # Small shapes consistent with the module: batch=2, seq=8, hidden(n_units)=32.
    batch, seq, n_units = 2, 8, 32
    x = jax.random.normal(k_x, (batch, seq, n_units), dtype=jnp.float32)

    # Non-trivial synthetic parameters (module __init__ gives shift=0, scale=1).
    shift = jax.random.normal(k_shift, (n_units,), dtype=jnp.float32) * 0.1
    scale = 1.0 + jax.random.normal(k_scale, (n_units,), dtype=jnp.float32) * 0.1

    out = prenorm_forward(x, shift, scale)
    out = jax.block_until_ready(out)
    ref = (x + shift) * scale
    assert jnp.allclose(out, ref, atol=1e-6, rtol=1e-6), "mismatch vs reference (folded path)"

    # Second check: already lane-dense features (n_units=128) with a row count
    # that is not a multiple of the tile -> exercises the ragged last block.
    n2 = 128
    x_b = jax.random.normal(k_x2, (200, n2), dtype=jnp.float32)
    shift_b = jnp.linspace(-0.5, 0.5, n2, dtype=jnp.float32)
    scale_b = jnp.linspace(0.5, 1.5, n2, dtype=jnp.float32)
    out_b = prenorm_forward(x_b, shift_b, scale_b, tile_rows=64)
    out_b = jax.block_until_ready(out_b)
    ref_b = (x_b + shift_b) * scale_b
    assert jnp.allclose(out_b, ref_b, atol=1e-6, rtol=1e-6), "mismatch vs reference (ragged path)"

    print("KERNEL_OK")
</pallas_src>

<mosaic_0001>
module attributes {stable_mosaic.version = 11 : i64} {
  func.func @_prenorm_kernel(%arg0: i32, %arg1: memref<4x128xf32, #tpu.memory_space<vmem>>, %arg2: memref<1x128xf32, #tpu.memory_space<vmem>>, %arg3: memref<1x128xf32, #tpu.memory_space<vmem>>, %arg4: memref<4x128xf32, #tpu.memory_space<vmem>>) attributes {dimension_semantics = [#tpu.dimension_semantics<parallel>], iteration_bounds = array<i64: 1>, scalar_prefetch = 0 : i64, scratch_operands = 0 : i64, tpu.core_type = #tpu.core_type<tc>, window_params = [{transform_indices = @transform_0, window_bounds = array<i64: 4, 128>}, {pipeline_mode = #tpu.pipeline_mode<synchronous>, transform_indices = @transform_1, window_bounds = array<i64: 1, 128>}, {pipeline_mode = #tpu.pipeline_mode<synchronous>, transform_indices = @transform_2, window_bounds = array<i64: 1, 128>}, {transform_indices = @transform_3, window_bounds = array<i64: 4, 128>}]} {
    %c0 = arith.constant 0 : index
    %c0_0 = arith.constant 0 : index
    %0 = vector.load %arg1[%c0, %c0_0] : memref<4x128xf32, #tpu.memory_space<vmem>>, vector<4x128xf32>
    %c0_1 = arith.constant 0 : index
    %c0_2 = arith.constant 0 : index
    %1 = vector.load %arg2[%c0_1, %c0_2] : memref<1x128xf32, #tpu.memory_space<vmem>>, vector<1x128xf32>
    %2 = vector.broadcast %1 : vector<1x128xf32> to vector<4x128xf32>
    %3 = arith.addf %0, %2 : vector<4x128xf32>
    %c0_3 = arith.constant 0 : index
    %c0_4 = arith.constant 0 : index
    %4 = vector.load %arg3[%c0_3, %c0_4] : memref<1x128xf32, #tpu.memory_space<vmem>>, vector<1x128xf32>
    %5 = vector.broadcast %4 : vector<1x128xf32> to vector<4x128xf32>
    %6 = arith.mulf %3, %5 : vector<4x128xf32>
    %c0_5 = arith.constant 0 : index
    %c0_6 = arith.constant 0 : index
    %7 = vector.load %arg4[%c0_5, %c0_6] : memref<4x128xf32, #tpu.memory_space<vmem>>, vector<4x128xf32>
    tpu.vector_store %arg4[%c0_5, %c0_6], %6 {strides = array<i32>} : memref<4x128xf32, #tpu.memory_space<vmem>>, vector<4x128xf32>,
    return
  }
  func.func @transform_0(%arg0: i32) -> (i32, i32) {
    %c0_i32 = arith.constant 0 : i32
    %c0_i32_0 = arith.constant 0 : i32
    return %arg0, %c0_i32 : i32, i32
  }
  func.func @transform_1(%arg0: i32) -> (i32, i32) {
    %c0_i32 = arith.constant 0 : i32
    %c0_i32_0 = arith.constant 0 : i32
    %c0_i32_1 = arith.constant 0 : i32
    return %c0_i32, %c0_i32_0 : i32, i32
  }
  func.func @transform_2(%arg0: i32) -> (i32, i32) {
    %c0_i32 = arith.constant 0 : i32
    %c0_i32_0 = arith.constant 0 : i32
    %c0_i32_1 = arith.constant 0 : i32
    return %c0_i32, %c0_i32_0 : i32, i32
  }
  func.func @transform_3(%arg0: i32) -> (i32, i32) {
    %c0_i32 = arith.constant 0 : i32
    %c0_i32_0 = arith.constant 0 : i32
    return %arg0, %c0_i32 : i32, i32
  }
}

</mosaic_0001>

<bundles_post_ra>
// kernel: tpu_custom_call.1
= control target key start
LH: loop header
LB: loop body
LE: loop exit
PB: predicated region body
PF: predicated region fallthrough
CT: control target
= control target key end

     0   :  { %8 = vsyncpa [#allocation3], 0  ;;  %s164_s0 = inlined_call_operand.hbm [shape: f32[4,128], index: 0, kind: input, shape index: {}]   ;;  %s165_s1 = inlined_call_operand.vmem [shape: f32[1,128], index: 1, kind: input, shape index: {}]   ;;  %s166_s2 = inlined_call_operand.vmem [shape: f32[1,128], index: 2, kind: input, shape index: {}]   ;;  %s167_s3 = inlined_call_operand.hbm [shape: f32[4,128], index: 3, kind: output, shape index: {}]  }
   0x1   :  { %9 = vsyncpa [#allocation4], 0  ;;  %s112_s12 = smov [#allocation2]   ;;  %s64_s16 = scalar_lea.hbm %s164_s0, 64 }
   0x2   :  { %s16_s13 = sshll.u32 %s112_s12, 4  ;;  %p65_p0 = scmp.ne.s32.totalorder %s164_s0, %s64_s16  ;;  %s17_s13 = int_to_ptr.vmem [resolvable:$true] %s16_s13 }
   0x3   :  { %p68_p1 = scmp.lt.u32.totalorder %s64_s16, %s164_s0 }
   0x5   :  { %p70_p2 = pnand %p68_p1, %p65_p0 }
   0x7   :  { %73 = shalt.err (!%p70_p2)
}
   0x8   :  { %s74_s21 = scalar_lea.vmem %s17_s13, 64  ;;  %p79_p4 = scmp.lt.s32.totalorder %s17_s13, %s17_s13 }
   0x9   :  { %p75_p3 = scmp.ne.s32.totalorder %s17_s13, %s74_s21  ;;  %p80_p5 = scmp.lt.s32.totalorder %s74_s21, %s74_s21 }
   0xb   :  { %p81_p6 = por %p80_p5, %p79_p4 }
   0xd   :  { %p82_p7 = pnand %p81_p6, %p75_p3 }
   0xf   :  { %85 = shalt.err (!%p82_p7)
}
  0x10   :  { %19 = dma.hbm_to_vmem [thread:$0]  %s164_s0, 64, %s17_s13, [#allocation3]  }
  0x11   :  { %108 = dma.done.wait [#allocation3], 64  }
  0x12   :  { %109 = vsyncadd [#allocation3], 4294967232  ;;  %s113_s24 = smov [#allocation5]   ;;  %v27_v0 = vld [vmem:[#allocation2] sm:$0xf] }
  0x13   :  { %s51_s25 = sshll.u32 %s113_s24, 4  ;;  %v60_v1 = vld [vmem:[%s165_s1] ss:$0 sm:$0xff]  ;;  %s52_s25 = int_to_ptr.vmem [resolvable:$true] %s51_s25 }
  0x14   :  { %v61_v2 = vld [vmem:[%s166_s2] ss:$0 sm:$0xff]  ;;  %v35_v3 = vadd.f32 %v60_v1, %v27_v0  ;;  %s86_s30 = scalar_lea.vmem %s52_s25, 64  ;;  %p91_p9 = scmp.lt.s32.totalorder %s52_s25, %s52_s25 }
  0x15   :  { %p87_p8 = scmp.ne.s32.totalorder %s52_s25, %s86_s30  ;;  %p92_p10 = scmp.lt.s32.totalorder %s86_s30, %s86_s30 }
  0x16   :  { %v43_v4 = vmul.f32 %v61_v2, %v35_v3 }
  0x17   :  { %p93_p11 = por %p92_p10, %p91_p9 }
  0x18   :  { %44 = vst [vmem:[#allocation5] sm:$0xf] %v43_v4 }
  0x19   :  { %p94_p12 = pnand %p93_p11, %p87_p8 }
  0x1b   :  { %97 = shalt.err (!%p94_p12)
}
  0x1c   :  { %s98_s5 = scalar_lea.hbm %s167_s3, 64 }
  0x1d   :  { %p99_p13 = scmp.ne.s32.totalorder %s167_s3, %s98_s5  ;;  %p102_p0 = scmp.lt.u32.totalorder %s98_s5, %s167_s3 }
  0x1f   :  { %p104_p1 = pnand %p102_p0, %p99_p13 }
  0x21   :  { %107 = shalt.err (!%p104_p1)
}
  0x22   :  { %54 = dma.vmem_to_hbm [thread:$0]  %s52_s25, 64, %s167_s3, [#allocation4]  }
  0x23   :  { %110 = dma.done.wait [#allocation4], 64  }
  0x24   :  { %111 = vsyncadd [#allocation4], 4294967232 }
  0x25   :  { %58 = vsyncpa [#allocation3], 1 }
  0x26   :  { %59 = vsyncpa [#allocation4], 1 }

</bundles_post_ra>
